<compile_context>
chip_gen: v5e
topology: v5e:2x2
jax: 0.10.0
libtpu: 0.0.40
codegen_flags: <defaults>
</compile_context>

<pallas_src>
import jax
import jax.numpy as jnp
from jax import lax
from jax.experimental import pallas as pl
from jax.experimental.pallas import tpu as pltpu


def mlp_kernel(x_ref, w1_ref, b1_ref, w2_ref, b2_ref, w3_ref, b3_ref,
               w4_ref, b4_ref, o_ref):
    x = x_ref[...]                                         # (TILE_B, NC) bf16

    # layer1 + ReLU (dropout = identity in eval mode)
    h = jnp.dot(x, w1_ref[...], preferred_element_type=jnp.float32) + b1_ref[...]
    h = jnp.maximum(h, 0.0).astype(jnp.bfloat16)           # (TILE_B, 64)

    # layer2 + ReLU
    h = jnp.dot(h, w2_ref[...], preferred_element_type=jnp.float32) + b2_ref[...]
    h = jnp.maximum(h, 0.0).astype(jnp.bfloat16)           # (TILE_B, 256)

    # layer3 + ReLU
    h = jnp.dot(h, w3_ref[...], preferred_element_type=jnp.float32) + b3_ref[...]
    h = jnp.maximum(h, 0.0).astype(jnp.bfloat16)           # (TILE_B, 64)

    # layer4 (no activation), lane-dense: (1,64) . (TILE_B,64)^T -> (1, TILE_B)
    out_row = lax.dot_general(
        w4_ref[...], h,
        dimension_numbers=(((1,), (1,)), ((), ())),
        preferred_element_type=jnp.float32,
    ) + b4_ref[...]                                        # (1, TILE_B)
    o_ref[...] = out_row.astype(o_ref.dtype)


def init_params(key, num_classes):
    """Deterministic PyTorch-like init: U(-1/sqrt(fan_in), 1/sqrt(fan_in)).

    Weights are bf16 (MXU-native), biases f32.  w1..w3 are (in, out); w4 is (1, 64).
    """
    dims = [(num_classes, 64), (64, 256), (256, 64), (64, 1)]
    params = []
    for li, (fan_in, fan_out) in enumerate(dims):
        key, kw, kb = jax.random.split(key, 3)
        bound = 1.0 / jnp.sqrt(jnp.asarray(fan_in, jnp.float32))
        w = jax.random.uniform(kw, (fan_in, fan_out), jnp.float32, -bound, bound)
        b = jax.random.uniform(kb, (1, fan_out), jnp.float32, -bound, bound)
        if li == 3:
            w = w.T  # final layer kept as (out=1, in=64) for the NT matmul
        params.extend([w.astype(jnp.bfloat16), b])
    return params


def mlp_forward(x, params, tile_b=512):
    batch, nc = x.shape
    assert tile_b % 128 == 0, "tile_b must be a multiple of 128 (lane-dense output)"
    num_tiles = pl.cdiv(batch, tile_b)
    padded = num_tiles * tile_b

    xb = x.astype(jnp.bfloat16)
    if padded != batch:
        xb = jnp.pad(xb, ((0, padded - batch), (0, 0)))

    full = lambda a: pl.BlockSpec(a.shape, lambda i: tuple(0 for _ in a.shape))
    in_specs = [pl.BlockSpec((tile_b, nc), lambda i: (i, 0))] + [full(p) for p in params]
    out_spec = pl.BlockSpec((1, tile_b), lambda i: (0, i))

    out = pl.pallas_call(
        mlp_kernel,
        out_shape=jax.ShapeDtypeStruct((1, padded), jnp.float32),
        grid=(num_tiles,),
        in_specs=in_specs,
        out_specs=out_spec,
        compiler_params=pltpu.CompilerParams(
            dimension_semantics=("parallel",),
            vmem_limit_bytes=8 << 20,
        ),
    )(xb, *params)

    return out.reshape(padded, 1)[:batch]


def mlp_reference(x, params):
    w1, b1, w2, b2, w3, b3, w4, b4 = params
    h = x.astype(jnp.bfloat16)
    h = jnp.maximum(jnp.dot(h, w1, preferred_element_type=jnp.float32) + b1, 0.0)
    h = jnp.maximum(jnp.dot(h.astype(jnp.bfloat16), w2,
                            preferred_element_type=jnp.float32) + b2, 0.0)
    h = jnp.maximum(jnp.dot(h.astype(jnp.bfloat16), w3,
                            preferred_element_type=jnp.float32) + b3, 0.0)
    return jnp.dot(h.astype(jnp.bfloat16), w4.T,
                   preferred_element_type=jnp.float32) + b4


if __name__ == "__main__":
    key = jax.random.PRNGKey(0)
    num_classes = 16
    batch = 300          # non-multiple of tile -> exercises padding + multi-tile grid
    tile_b = 128

    kx, kp = jax.random.split(key)
    x = jax.random.normal(kx, (batch, num_classes), jnp.float32)
    params = init_params(kp, num_classes)

    out = mlp_forward(x, params, tile_b=tile_b)
    out = jax.block_until_ready(out)

    ref = mlp_reference(x, params)
    assert out.shape == (batch, 1)
    assert jnp.allclose(out, ref, atol=1e-3, rtol=1e-3), (
        float(jnp.max(jnp.abs(out - ref))))

    print("KERNEL_OK")
</pallas_src>

<mosaic_0001>
module attributes {stable_mosaic.version = 11 : i64} {
  func.func @mlp_kernel(%arg0: i32, %arg1: memref<128x16xbf16, #tpu.memory_space<vmem>>, %arg2: memref<16x64xbf16, #tpu.memory_space<vmem>>, %arg3: memref<1x64xf32, #tpu.memory_space<vmem>>, %arg4: memref<64x256xbf16, #tpu.memory_space<vmem>>, %arg5: memref<1x256xf32, #tpu.memory_space<vmem>>, %arg6: memref<256x64xbf16, #tpu.memory_space<vmem>>, %arg7: memref<1x64xf32, #tpu.memory_space<vmem>>, %arg8: memref<1x64xbf16, #tpu.memory_space<vmem>>, %arg9: memref<1x1xf32, #tpu.memory_space<vmem>>, %arg10: memref<1x128xf32, #tpu.memory_space<vmem>>) attributes {dimension_semantics = [#tpu.dimension_semantics<parallel>], iteration_bounds = array<i64: 3>, scalar_prefetch = 0 : i64, scratch_operands = 0 : i64, tpu.core_type = #tpu.core_type<tc>, window_params = [{transform_indices = @transform_0, window_bounds = array<i64: 128, 16>}, {pipeline_mode = #tpu.pipeline_mode<synchronous>, transform_indices = @transform_1, window_bounds = array<i64: 16, 64>}, {pipeline_mode = #tpu.pipeline_mode<synchronous>, transform_indices = @transform_2, window_bounds = array<i64: 1, 64>}, {pipeline_mode = #tpu.pipeline_mode<synchronous>, transform_indices = @transform_3, window_bounds = array<i64: 64, 256>}, {pipeline_mode = #tpu.pipeline_mode<synchronous>, transform_indices = @transform_4, window_bounds = array<i64: 1, 256>}, {pipeline_mode = #tpu.pipeline_mode<synchronous>, transform_indices = @transform_5, window_bounds = array<i64: 256, 64>}, {pipeline_mode = #tpu.pipeline_mode<synchronous>, transform_indices = @transform_6, window_bounds = array<i64: 1, 64>}, {pipeline_mode = #tpu.pipeline_mode<synchronous>, transform_indices = @transform_7, window_bounds = array<i64: 1, 64>}, {pipeline_mode = #tpu.pipeline_mode<synchronous>, transform_indices = @transform_8, window_bounds = array<i64: 1, 1>}, {transform_indices = @transform_9, window_bounds = array<i64: 1, 128>}]} {
    %c0 = arith.constant 0 : index
    %c0_0 = arith.constant 0 : index
    %0 = vector.load %arg1[%c0, %c0_0] : memref<128x16xbf16, #tpu.memory_space<vmem>>, vector<128x16xbf16>
    %c0_1 = arith.constant 0 : index
    %c0_2 = arith.constant 0 : index
    %1 = vector.load %arg2[%c0_1, %c0_2] : memref<16x64xbf16, #tpu.memory_space<vmem>>, vector<16x64xbf16>
    %cst = arith.constant dense<0.000000e+00> : vector<128x64xf32>
    %2 = tpu.matmul %0, %1, %cst {dimension_numbers = #tpu.dot_dimension_numbers<[1], [0], [0], [1], [0, 0, 1, 1], [], []>} : vector<128x16xbf16>, vector<16x64xbf16>, vector<128x64xf32> -> vector<128x64xf32>
    %c0_3 = arith.constant 0 : index
    %c0_4 = arith.constant 0 : index
    %3 = vector.load %arg3[%c0_3, %c0_4] : memref<1x64xf32, #tpu.memory_space<vmem>>, vector<1x64xf32>
    %4 = vector.broadcast %3 : vector<1x64xf32> to vector<128x64xf32>
    %5 = arith.addf %2, %4 : vector<128x64xf32>
    %cst_5 = arith.constant 0.000000e+00 : f32
    %6 = vector.broadcast %cst_5 : f32 to vector<128x64xf32>
    %7 = arith.maximumf %5, %6 : vector<128x64xf32>
    %8 = arith.truncf %7 : vector<128x64xf32> to vector<128x64xbf16>
    %c0_6 = arith.constant 0 : index
    %c0_7 = arith.constant 0 : index
    %9 = vector.load %arg4[%c0_6, %c0_7] : memref<64x256xbf16, #tpu.memory_space<vmem>>, vector<64x256xbf16>
    %cst_8 = arith.constant dense<0.000000e+00> : vector<128x256xf32>
    %10 = tpu.matmul %8, %9, %cst_8 {dimension_numbers = #tpu.dot_dimension_numbers<[1], [0], [0], [1], [0, 0, 1, 1], [], []>} : vector<128x64xbf16>, vector<64x256xbf16>, vector<128x256xf32> -> vector<128x256xf32>
    %c0_9 = arith.constant 0 : index
    %c0_10 = arith.constant 0 : index
    %11 = vector.load %arg5[%c0_9, %c0_10] : memref<1x256xf32, #tpu.memory_space<vmem>>, vector<1x256xf32>
    %12 = vector.broadcast %11 : vector<1x256xf32> to vector<128x256xf32>
    %13 = arith.addf %10, %12 : vector<128x256xf32>
    %cst_11 = arith.constant 0.000000e+00 : f32
    %14 = vector.broadcast %cst_11 : f32 to vector<128x256xf32>
    %15 = arith.maximumf %13, %14 : vector<128x256xf32>
    %16 = arith.truncf %15 : vector<128x256xf32> to vector<128x256xbf16>
    %c0_12 = arith.constant 0 : index
    %c0_13 = arith.constant 0 : index
    %17 = vector.load %arg6[%c0_12, %c0_13] : memref<256x64xbf16, #tpu.memory_space<vmem>>, vector<256x64xbf16>
    %cst_14 = arith.constant dense<0.000000e+00> : vector<128x64xf32>
    %18 = tpu.matmul %16, %17, %cst_14 {dimension_numbers = #tpu.dot_dimension_numbers<[1], [0], [0], [1], [0, 0, 1, 1], [], []>} : vector<128x256xbf16>, vector<256x64xbf16>, vector<128x64xf32> -> vector<128x64xf32>
    %c0_15 = arith.constant 0 : index
    %c0_16 = arith.constant 0 : index
    %19 = vector.load %arg7[%c0_15, %c0_16] : memref<1x64xf32, #tpu.memory_space<vmem>>, vector<1x64xf32>
    %20 = vector.broadcast %19 : vector<1x64xf32> to vector<128x64xf32>
    %21 = arith.addf %18, %20 : vector<128x64xf32>
    %cst_17 = arith.constant 0.000000e+00 : f32
    %22 = vector.broadcast %cst_17 : f32 to vector<128x64xf32>
    %23 = arith.maximumf %21, %22 : vector<128x64xf32>
    %24 = arith.truncf %23 : vector<128x64xf32> to vector<128x64xbf16>
    %c0_18 = arith.constant 0 : index
    %c0_19 = arith.constant 0 : index
    %25 = vector.load %arg8[%c0_18, %c0_19] : memref<1x64xbf16, #tpu.memory_space<vmem>>, vector<1x64xbf16>
    %cst_20 = arith.constant dense<0.000000e+00> : vector<1x128xf32>
    %26 = tpu.matmul %25, %24, %cst_20 {dimension_numbers = #tpu.dot_dimension_numbers<[1], [1], [0], [0], [0, 0, 1, 0], [], []>} : vector<1x64xbf16>, vector<128x64xbf16>, vector<1x128xf32> -> vector<1x128xf32>
    %c0_21 = arith.constant 0 : index
    %c0_22 = arith.constant 0 : index
    %27 = vector.load %arg9[%c0_21, %c0_22] : memref<1x1xf32, #tpu.memory_space<vmem>>, vector<1x1xf32>
    %28 = vector.broadcast %27 : vector<1x1xf32> to vector<1x128xf32>
    %29 = arith.addf %26, %28 : vector<1x128xf32>
    %c0_23 = arith.constant 0 : index
    %c0_24 = arith.constant 0 : index
    %30 = vector.load %arg10[%c0_23, %c0_24] : memref<1x128xf32, #tpu.memory_space<vmem>>, vector<1x128xf32>
    tpu.vector_store %arg10[%c0_23, %c0_24], %29 {strides = array<i32>} : memref<1x128xf32, #tpu.memory_space<vmem>>, vector<1x128xf32>,
    return
  }
  func.func @transform_0(%arg0: i32) -> (i32, i32) {
    %c0_i32 = arith.constant 0 : i32
    %c0_i32_0 = arith.constant 0 : i32
    return %arg0, %c0_i32 : i32, i32
  }
  func.func @transform_1(%arg0: i32) -> (i32, i32) {
    %c0_i32 = arith.constant 0 : i32
    %c0_i32_0 = arith.constant 0 : i32
    %c0_i32_1 = arith.constant 0 : i32
    return %c0_i32, %c0_i32_0 : i32, i32
  }
  func.func @transform_2(%arg0: i32) -> (i32, i32) {
    %c0_i32 = arith.constant 0 : i32
    %c0_i32_0 = arith.constant 0 : i32
    %c0_i32_1 = arith.constant 0 : i32
    return %c0_i32, %c0_i32_0 : i32, i32
  }
  func.func @transform_3(%arg0: i32) -> (i32, i32) {
    %c0_i32 = arith.constant 0 : i32
    %c0_i32_0 = arith.constant 0 : i32
    %c0_i32_1 = arith.constant 0 : i32
    return %c0_i32, %c0_i32_0 : i32, i32
  }
  func.func @transform_4(%arg0: i32) -> (i32, i32) {
    %c0_i32 = arith.constant 0 : i32
    %c0_i32_0 = arith.constant 0 : i32
    %c0_i32_1 = arith.constant 0 : i32
    return %c0_i32, %c0_i32_0 : i32, i32
  }
  func.func @transform_5(%arg0: i32) -> (i32, i32) {
    %c0_i32 = arith.constant 0 : i32
    %c0_i32_0 = arith.constant 0 : i32
    %c0_i32_1 = arith.constant 0 : i32
    return %c0_i32, %c0_i32_0 : i32, i32
  }
  func.func @transform_6(%arg0: i32) -> (i32, i32) {
    %c0_i32 = arith.constant 0 : i32
    %c0_i32_0 = arith.constant 0 : i32
    %c0_i32_1 = arith.constant 0 : i32
    return %c0_i32, %c0_i32_0 : i32, i32
  }
  func.func @transform_7(%arg0: i32) -> (i32, i32) {
    %c0_i32 = arith.constant 0 : i32
    %c0_i32_0 = arith.constant 0 : i32
    %c0_i32_1 = arith.constant 0 : i32
    return %c0_i32, %c0_i32_0 : i32, i32
  }
  func.func @transform_8(%arg0: i32) -> (i32, i32) {
    %c0_i32 = arith.constant 0 : i32
    %c0_i32_0 = arith.constant 0 : i32
    %c0_i32_1 = arith.constant 0 : i32
    return %c0_i32, %c0_i32_0 : i32, i32
  }
  func.func @transform_9(%arg0: i32) -> (i32, i32) {
    %c0_i32 = arith.constant 0 : i32
    %c0_i32_0 = arith.constant 0 : i32
    return %c0_i32, %arg0 : i32, i32
  }
}

</mosaic_0001>

<bundles_post_ra>
// kernel: tpu_custom_call.1
= control target key start
LH: loop header
LB: loop body
LE: loop exit
PB: predicated region body
PF: predicated region fallthrough
CT: control target
= control target key end

     0   :  { %s1783_s0 = inlined_call_operand.vmem [shape: bf16[384,16], index: 0, kind: input, shape index: {}]   ;;  %s1784_s1 = inlined_call_operand.vmem [shape: bf16[16,64], index: 1, kind: input, shape index: {}]   ;;  %s1785_s2 = inlined_call_operand.vmem [shape: f32[1,64], index: 2, kind: input, shape index: {}]   ;;  %s1786_s3 = inlined_call_operand.vmem [shape: bf16[64,256], index: 3, kind: input, shape index: {}]   ;;  %s1787_s4 = inlined_call_operand.vmem [shape: f32[1,256], index: 4, kind: input, shape index: {}]   ;;  %s1788_s5 = inlined_call_operand.vmem [shape: bf16[256,64], index: 5, kind: input, shape index: {}]   ;;  %s1789_s6 = inlined_call_operand.vmem [shape: f32[1,64], index: 6, kind: input, shape index: {}]   ;;  %s1790_s7 = inlined_call_operand.vmem [shape: bf16[1,64], index: 7, kind: input, shape index: {}]   ;;  %s1791_s8 = inlined_call_operand.<no memory space> [shape: f32[1,1], index: 8, kind: input, shape index: {}]   ;;  %s1792_s9 = inlined_call_operand.hbm [shape: f32[1,384], index: 9, kind: output, shape index: {}]  }
   0x1   :  { %v14_v0 = vstv %s1791_s8 }
   0x2   :  { %15 = vst [vmem:[#allocation2] sm:$0x1] %v14_v0 }
   0x3   :  { %16 = vsyncpa [#allocation4], 0 }
   0x4   :  { %18 = vsyncpa [#allocation4 + $0x1], 0  ;;  %s1464_s11 = smov 0   ;;  %s1466_s12 = smov 0  }
   0x5   :  { %s1468_s13 = smov 0   ;;  %s1470_s14 = smov 0  }
   0x6 LB: > { %s1485_s8 = sadd.s32 4294967295, %s1408_s14   ;;  %s1097_s15 = sadd.s32 4294967294, %s1408_s14   ;;  %s1408_s14 = sphi %s1470_s14, %s1798_s14   ;;  %s1404_s13 = sphi %s1468_s13, %s1797_s13   ;;  %s1400_s12 = sphi %s1466_s12, %s1796_s12   ;;  %s1396_s11 = sphi %s1464_s11, %s1795_s11  }
   0x7   : > { %s1489_s16 = sadd.s32 1, %s1408_s14   ;;  %s225_s17 = sadd.s32 1, %s1404_s13 }
   0x8   : > { %s222_s18 = ssub.s32 %s1408_s14, %s1489_s16  ;;  %p235_p0 = scmp.ne.s32.totalorder %s1404_s13, %s1400_s12 }
   0x9   : > { %p223_p1 = scmp.eq.s32.totalorder %s222_s18, 0  ;;  %p236_p2 = scmp.eq.s32.totalorder %s1485_s8, 2 }
   0xa   : > { %p241_p3 = scmp.ne.s32.totalorder %s1400_s12, %s1396_s11  ;;  %p242_p4 = scmp.eq.s32.totalorder %s1097_s15, 2 }
   0xb   : > { %s1500_s19 = scalar_select %p223_p1, %s1404_s13, %s225_s17  }
   0xc   : > { %p1502_p5 = por %p236_p2, %p235_p0  ;;  %p1506_p6 = por %p242_p4, %p241_p3 }
   0xd   : > { %p1100_p7 = scmp.ge.s32.totalorder %s1408_s14, 1  ;;  %p293_p8 = scmp.lt.s32.totalorder %s1408_s14, 4 }
   0xf   : > { %p294_p9 = pnand %p1100_p7, %p293_p8 }
  0x10   : > { %s1101_s24 = sshll.u32 (!%p294_p9), %s1485_s8, 4  ;;  %s1038_s27 = scalar_lea.hbm (!%p294_p9), %s1792_s9, %s1485_s8 }
  0x11   : > { %297 = sbr.rel (%p294_p9) target bundleno = 768 (0x300), region = 56  ;;  %p329_p10 = scmp.lt.s32.totalorder (!%p294_p9), %s1101_s24, 47 }
  0x12   : > { %s1042_s10 = sshll.u32 (!%p294_p9), %s1038_s27, 4  ;;  %s1366_s8 = scalar_lea.hbm (!%p294_p9), %s1792_s9, 3  ;;  %s1043_s10 = int_to_ptr.hbm [resolvable:$true] %s1042_s10 }
  0x13   : > { %s1360_s17 = sshra.s32 (!%p294_p9), %s1043_s10, 4  ;;  %s1361_s17 = int_to_ptr.hbm [resolvable:$true] %s1360_s17 }
  0x14   : > { %s1362_s18 = scalar_lea.hbm (!%p294_p9), %s1361_s17, 1  ;;  %p1367_p0 = scmp.lt.s32.totalorder (!%p294_p9), %s1361_s17, %s1792_s9 }
  0x15   : > { %p1363_p11 = scmp.ne.s32.totalorder (!%p294_p9), %s1361_s17, %s1362_s18  ;;  %p1368_p1 = scmp.lt.s32.totalorder (!%p294_p9), %s1366_s8, %s1362_s18 }
  0x16   : > { %v1270_v1 = vld [vmem:[%s1784_s1] sm:$0xff]  ;;  %s1800_s24 = smov (!%p329_p10, %s1101_s24), 47  ;;  %vm403_vm0 = vcmask 130048   ;;  %v1173_v8 = vld [vmem:[%s1786_s3 + $0x30] sm:$0xf]  ;;  %vm555_vm1 = vcmask 523264  }
  0x17   : > { %435 = vmatpush.bf16.msra.mxu0 %v1270_v1  ;;  %s1102_s25 = sshll.u32 %s1800_s24, 2  ;;  %v1278_v9 = vld [vmem:[%s1786_s3 + $0x34] sm:$0xf0]  ;;  %v1277_v10 = vld [vmem:[%s1786_s3 + $0x34] sm:$0xf]  ;;  %p1364_p12 = pnand %p1363_p11, %p1502_p5 }
  0x18   : > { %s1519_s28 = scalar_lea.vmem %s1783_s0, %s1102_s25  ;;  %v1174_v11 = vor.u32 %v1278_v9, %v1173_v8  ;;  %v1175_v12 = vld [vmem:[%s1786_s3 + $0x38] sm:$0xf0]  ;;  %v1165_v15 = vld [vmem:[%s1786_s3 + $0x20] sm:$0xf]  ;;  %v1276_v16 = vld [vmem:[%s1786_s3 + $0x24] sm:$0xf0]  ;;  %p1369_p2 = por %p1368_p1, %p1367_p0 }
  0x19   : > { %v1262_v2 = vld [vmem:[%s1519_s28] sm:$0xff]  ;;  %v1263_v3 = vld [vmem:[%s1519_s28 + $0x8] sm:$0xff]  ;;  %v1264_v4 = vld [vmem:[%s1519_s28 + $0x10] sm:$0xff]  ;;  %v1178_v14 = vor.u32 %v1277_v10, %v1175_v12  ;;  %v1166_v18 = vor.u32 %v1276_v16, %v1165_v15  ;;  %s326_s25 = sand.u32 1, %s1400_s12   ;;  %p1365_p13 = pneg %p1364_p12 }
  0x1a   : > { %1139 = vmatmul.msk.bf16.vlgmr.msra.gmra.mxu0 %vm403_vm0, %v1262_v2  ;;  %v1265_v5 = vld [vmem:[%s1519_s28 + $0x18] sm:$0xff]  ;;  %v1266_v6 = vld [vmem:[%s1519_s28 + $0x20] sm:$0xff]  ;;  %v1267_v7 = vld [vmem:[%s1519_s28 + $0x28] sm:$0xff]  ;;  %584 = vmatpush.bf16.msra.mxu1 %v1174_v11  ;;  %s327_s29 = scalar_lea.vmem [#allocation3], %s326_s25  ;;  %s1030_s15 = scalar_lea.sflag [#allocation4], %s326_s25 }
  0x1b   : > { %v1268_v13 = vld [vmem:[%s1519_s28 + $0x30] sm:$0xff]  ;;  %633 = vmatpush.bf16.msra.mxu2 %v1178_v14  ;;  %v1275_v17 = vld [vmem:[%s1786_s3 + $0x24] sm:$0xf]  ;;  %v1167_v19 = vld [vmem:[%s1786_s3 + $0x28] sm:$0xf0]  ;;  %s1040_s30 = sshll.u32 %s327_s29, 4  ;;  %p1370_p3 = pnand %p1369_p2, %p1365_p13  ;;  %s1041_s30 = int_to_ptr.vmem [resolvable:$true] %s1040_s30 }
  0x1c   : > { %v1170_v20 = vor.u32 %v1275_v17, %v1167_v19  ;;  %v1157_v21 = vld [vmem:[%s1786_s3 + $0x10] sm:$0xf]  ;;  %v1274_v22 = vld [vmem:[%s1786_s3 + $0x14] sm:$0xf0]  ;;  %v1273_v23 = vld [vmem:[%s1786_s3 + $0x14] sm:$0xf] }
  0x1d   : > { %v1158_v24 = vor.u32 %v1274_v22, %v1157_v21  ;;  %v1159_v25 = vld [vmem:[%s1786_s3 + $0x18] sm:$0xf0]  ;;  %v1149_v27 = vld [vmem:[%s1786_s3] sm:$0xf]  ;;  %v1272_v28 = vld [vmem:[%s1786_s3 + $0x4] sm:$0xf0] }
  0x1e   : > { %585 = vmatpush.bf16.msra.mxu1 %v1166_v18  ;;  %v1162_v26 = vor.u32 %v1273_v23, %v1159_v25  ;;  %v1271_v29 = vld [vmem:[%s1786_s3 + $0x4] sm:$0xf]  ;;  %v1150_v30 = vor.u32 %v1272_v28, %v1149_v27  ;;  %v1151_v31 = vld [vmem:[%s1786_s3 + $0x8] sm:$0xf0]  ;;  %v1269_v33 = vld [vmem:[%s1519_s28 + $0x38] sm:$0xff] }
  0x1f   : > { %634 = vmatpush.bf16.msra.mxu2 %v1170_v20  ;;  %v1154_v32 = vor.u32 %v1271_v29, %v1151_v31  ;;  %v1588_v35 = vld [vmem:[%s1785_s2] ss:$0 sm:$0xff]  ;;  %v1286_v10 = vld [vmem:[%s1788_s5 + $0x38] sm:$0xff]  ;;  %v1285_v14 = vld [vmem:[%s1788_s5 + $0x30] sm:$0xff] }
  0x20   : > { %858 = vmatpush.bf16.msra.mxu3 %v1286_v10  ;;  %v1294_v15 = vld [vmem:[%s1788_s5 + $0x78] sm:$0xff]  ;;  %v1284_v17 = vld [vmem:[%s1788_s5 + $0x28] sm:$0xff]  ;;  %v1293_v18 = vld [vmem:[%s1788_s5 + $0x70] sm:$0xff] }
  0x21   : > { %907 = vmatpush.bf16.msrb.mxu0 %v1294_v15  ;;  %v1283_v19 = vld [vmem:[%s1788_s5 + $0x20] sm:$0xff]  ;;  %v1292_v20 = vld [vmem:[%s1788_s5 + $0x68] sm:$0xff]  ;;  %v1281_v29 = vld [vmem:[%s1788_s5 + $0x10] sm:$0xff] }
  0x22   : > { %586 = vmatpush.bf16.msra.mxu1 %v1158_v24  ;;  %v1282_v24 = vld [vmem:[%s1788_s5 + $0x18] sm:$0xff]  ;;  %v1291_v27 = vld [vmem:[%s1788_s5 + $0x60] sm:$0xff] }
  0x23   : > { %635 = vmatpush.bf16.msra.mxu2 %v1162_v26  ;;  %v1290_v31 = vld [vmem:[%s1788_s5 + $0x58] sm:$0xff] }
  0x24   : > { %859 = vmatpush.bf16.msra.mxu3 %v1285_v14 }
  0x25   : > { %908 = vmatpush.bf16.msrb.mxu0 %v1293_v18 }
  0x26   : > { %587 = vmatpush.bf16.msra.mxu1 %v1150_v30 }
  0x27   : > { %636 = vmatpush.bf16.msra.mxu2 %v1154_v32  ;;  %v1280_v32 = vld [vmem:[%s1788_s5 + $0x8] sm:$0xff] }
  0x28   : > { %860 = vmatpush.bf16.msra.mxu3 %v1284_v17 }
  0x29   : > { %909 = vmatpush.bf16.msrb.mxu0 %v1292_v20 }
  0x2a   : > { %1140 = vmatmul.msk.bf16.gmra.mxu0 %vm403_vm0, %v1263_v3 }
  0x2b   : > { %1295 = vmatpush.bf16.msrb.mxu2 %v1294_v15 }
  0x2c   : > { %861 = vmatpush.bf16.msra.mxu3 %v1283_v19 }
  0x2d   : > { %910 = vmatpush.bf16.msrb.mxu0 %v1291_v27 }
  0x2f   : > { %1296 = vmatpush.bf16.msrb.mxu2 %v1293_v18 }
  0x30   : > { %862 = vmatpush.bf16.msra.mxu3 %v1282_v24 }
  0x31   : > { %911 = vmatpush.bf16.msrb.mxu0 %v1290_v31 }
  0x33   : > { %1297 = vmatpush.bf16.msrb.mxu2 %v1292_v20 }
  0x34   : > { %863 = vmatpush.bf16.msra.mxu3 %v1281_v29 }
  0x37   : > { %1298 = vmatpush.bf16.msrb.mxu2 %v1291_v27 }
  0x38   : > { %864 = vmatpush.bf16.msra.mxu3 %v1280_v32 }
  0x3a   : > { %1141 = vmatmul.msk.bf16.gmra.mxu0 %vm403_vm0, %v1264_v4 }
  0x3b   : > { %1299 = vmatpush.bf16.msrb.mxu2 %v1290_v31 }
  0x4a   : > { %1142 = vmatmul.msk.bf16.gmra.mxu0 %vm403_vm0, %v1265_v5 }
  0x5a   : > { %1143 = vmatmul.msk.bf16.gmra.mxu0 %vm403_vm0, %v1266_v6 }
  0x6a   : > { %1144 = vmatmul.msk.bf16.gmra.mxu0 %vm403_vm0, %v1267_v7 }
  0x7a   : > { %1145 = vmatmul.msk.bf16.gmra.mxu0 %vm403_vm0, %v1268_v13 }
  0x8a   : > { %1146 = vmatmul.msk.bf16.gmra.mxu0 %vm403_vm0, %v1269_v33  ;;  %v1289_v33 = vld [vmem:[%s1788_s5 + $0x50] sm:$0xff] }
  0x8b   : > { %912 = vmatpush.bf16.msrb.mxu0 %v1289_v33  ;;  %1300 = vmatpush.bf16.msrb.mxu2 %v1289_v33 }
  0x97   : > { %v437_v34 = vpop.f32.mrf.mxu0 }
  0x98   : > { %v438_v36 = vadd.f32 %v1588_v35, %v437_v34  ;;  %v1279_v34 = vld [vmem:[%s1788_s5] sm:$0xff] }
  0x99   : > { %865 = vmatpush.bf16.msra.mxu3 %v1279_v34 }
  0x9a   : > { %v477_v39 = vmax.f32 %v438_v36, 0.0 }
  0x9f   : > { %v439_v37 = vpop.f32.mrf.mxu0 }
  0xa0   : > { %v440_v38 = vadd.f32 %v1588_v35, %v439_v37 }
  0xa2   : > { %v478_v40 = vmax.f32 %v440_v38, 0.0  ;;  %v1288_v38 = vld [vmem:[%s1788_s5 + $0x48] sm:$0xff] }
  0xa3   : > { %913 = vmatpush.bf16.msrb.mxu0 %v1288_v38  ;;  %1301 = vmatpush.bf16.msrb.mxu2 %v1288_v38 }
  0xa4   : > { %v493_v41 = vpack.c.bf16 %v478_v40, %v477_v39 }
  0xa6   : > { %1179 = vmatmul.msk.bf16.vlgmr.msra.gmra.mxu1 %vm555_vm1, %v493_v41  ;;  %1187 = vmatmul.msk.bf16.vlgmr.msra.gmra.mxu2 %vm555_vm1, %v493_v41 }
  0xa7   : > { %v442_v42 = vpop.f32.mrf.mxu0 }
  0xa8   : > { %v443_v43 = vadd.f32 %v1588_v35, %v442_v42  ;;  %v1287_v42 = vld [vmem:[%s1788_s5 + $0x40] sm:$0xff] }
  0xa9   : > { %914 = vmatpush.bf16.msrb.mxu0 %v1287_v42  ;;  %1302 = vmatpush.bf16.msrb.mxu2 %v1287_v42 }
  0xaa   : > { %v479_v46 = vmax.f32 %v443_v43, 0.0 }
  0xaf   : > { %v444_v44 = vpop.f32.mrf.mxu0 }
  0xb0   : > { %v445_v45 = vadd.f32 %v1588_v35, %v444_v44  ;;  %v509_v44 = vld [vmem:[%s1787_s4] sm:$0x3] }
  0xb2   : > { %v480_v47 = vmax.f32 %v445_v45, 0.0  ;;  %v1673_v45 = vperm.slane %v509_v44, 0 }
  0xb4   : > { %v494_v48 = vpack.c.bf16 %v480_v47, %v479_v46 }
  0xb6   : > { %1180 = vmatmul.msk.bf16.gmra.mxu1 %vm555_vm1, %v494_v48  ;;  %1188 = vmatmul.msk.bf16.gmra.mxu2 %vm555_vm1, %v494_v48 }
  0xb7   : > { %v447_v49 = vpop.f32.mrf.mxu0 }
  0xb8   : > { %v448_v50 = vadd.f32 %v1588_v35, %v447_v49  ;;  %v1676_v49 = vperm.slane %v509_v44, 1 }
  0xba   : > { %v481_v53 = vmax.f32 %v448_v50, 0.0 }
  0xbf   : > { %v449_v51 = vpop.f32.mrf.mxu0 }
  0xc0   : > { %v450_v52 = vadd.f32 %v1588_v35, %v449_v51 }
  0xc2   : > { %v482_v54 = vmax.f32 %v450_v52, 0.0 }
  0xc4   : > { %v495_v55 = vpack.c.bf16 %v482_v54, %v481_v53 }
  0xc6   : > { %1181 = vmatmul.msk.bf16.gmra.mxu1 %vm555_vm1, %v495_v55  ;;  %1189 = vmatmul.msk.bf16.gmra.mxu2 %vm555_vm1, %v495_v55 }
  0xc7   : > { %v452_v56 = vpop.f32.mrf.mxu0 }
  0xc8   : > { %v453_v57 = vadd.f32 %v1588_v35, %v452_v56 }
  0xca   : > { %v483_v60 = vmax.f32 %v453_v57, 0.0 }
  0xcf   : > { %v454_v58 = vpop.f32.mrf.mxu0 }
  0xd0   : > { %v455_v59 = vadd.f32 %v1588_v35, %v454_v58 }
  0xd2   : > { %v484_v61 = vmax.f32 %v455_v59, 0.0 }
  0xd4   : > { %v496_v62 = vpack.c.bf16 %v484_v61, %v483_v60 }
  0xd6   : > { %1182 = vmatmul.msk.bf16.gmra.mxu1 %vm555_vm1, %v496_v62  ;;  %1190 = vmatmul.msk.bf16.gmra.mxu2 %vm555_vm1, %v496_v62 }
  0xd7   : > { %v457_v63 = vpop.f32.mrf.mxu0 }
  0xd8   : > { %v458_v0 = vadd.f32 %v1588_v35, %v457_v63 }
  0xda   : > { %v485_v3 = vmax.f32 %v458_v0, 0.0 }
  0xdf   : > { %v459_v1 = vpop.f32.mrf.mxu0 }
  0xe0   : > { %v460_v2 = vadd.f32 %v1588_v35, %v459_v1 }
  0xe2   : > { %v486_v4 = vmax.f32 %v460_v2, 0.0 }
  0xe4   : > { %v497_v5 = vpack.c.bf16 %v486_v4, %v485_v3 }
  0xe6   : > { %1183 = vmatmul.msk.bf16.gmra.mxu1 %vm555_vm1, %v497_v5  ;;  %1191 = vmatmul.msk.bf16.gmra.mxu2 %vm555_vm1, %v497_v5 }
  0xe7   : > { %v462_v6 = vpop.f32.mrf.mxu0 }
  0xe8   : > { %v463_v7 = vadd.f32 %v1588_v35, %v462_v6 }
  0xea   : > { %v487_v11 = vmax.f32 %v463_v7, 0.0 }
  0xef   : > { %v464_v8 = vpop.f32.mrf.mxu0 }
  0xf0   : > { %v465_v9 = vadd.f32 %v1588_v35, %v464_v8 }
  0xf2   : > { %v488_v12 = vmax.f32 %v465_v9, 0.0 }
  0xf4   : > { %v498_v13 = vpack.c.bf16 %v488_v12, %v487_v11 }
  0xf6   : > { %1184 = vmatmul.msk.bf16.gmra.mxu1 %vm555_vm1, %v498_v13  ;;  %1192 = vmatmul.msk.bf16.gmra.mxu2 %vm555_vm1, %v498_v13 }
  0xf7   : > { %v467_v16 = vpop.f32.mrf.mxu0 }
  0xf8   : > { %v468_v21 = vadd.f32 %v1588_v35, %v467_v16 }
  0xfa   : > { %v489_v25 = vmax.f32 %v468_v21, 0.0 }
  0xff   : > { %v469_v22 = vpop.f32.mrf.mxu0 }
 0x100   : > { %v470_v23 = vadd.f32 %v1588_v35, %v469_v22 }
 0x102   : > { %v490_v26 = vmax.f32 %v470_v23, 0.0 }
 0x104   : > { %v499_v28 = vpack.c.bf16 %v490_v26, %v489_v25 }
 0x106   : > { %1185 = vmatmul.msk.bf16.gmra.mxu1 %vm555_vm1, %v499_v28  ;;  %1193 = vmatmul.msk.bf16.gmra.mxu2 %vm555_vm1, %v499_v28 }
 0x107   : > { %v472_v30 = vpop.f32.mrf.mxu0 }
 0x108   : > { %v473_v36 = vadd.f32 %v1588_v35, %v472_v30 }
 0x10a   : > { %v491_v40 = vmax.f32 %v473_v36, 0.0 }
 0x10f   : > { %v474_v37 = vpop.f32.mrf.mxu0 }
 0x110   : > { %v475_v39 = vadd.f32 %v1588_v35, %v474_v37 }
 0x112   : > { %v492_v41 = vmax.f32 %v475_v39, 0.0 }
 0x114   : > { %v500_v43 = vpack.c.bf16 %v492_v41, %v491_v40 }
 0x116   : > { %1186 = vmatmul.msk.bf16.gmra.mxu1 %vm555_vm1, %v500_v43  ;;  %1194 = vmatmul.msk.bf16.gmra.mxu2 %vm555_vm1, %v500_v43 }
 0x123   : > { %v589_v35 = vpop.f32.mrf.mxu1 }
 0x124   : > { %v590_v47 = vadd.f32 %v589_v35, %v1673_v45 }
 0x126   : > { %v678_v51 = vmax.f32 %v590_v47, 0.0 }
 0x129   : > { %v638_v46 = vpop.f32.mrf.mxu2 }
 0x12a   : > { %v639_v53 = vadd.f32 %v638_v46, %v1676_v49 }
 0x12b   : > { %v591_v48 = vpop.f32.mrf.mxu1 }
 0x12c   : > { %v592_v50 = vadd.f32 %v591_v48, %v1673_v45  ;;  %v679_v58 = vmax.f32 %v639_v53, 0.0 }
 0x12e   : > { %v680_v52 = vmax.f32 %v592_v50, 0.0 }
 0x130   : > { %v710_v54 = vpack.c.bf16 %v680_v52, %v678_v51 }
 0x131   : > { %v640_v55 = vpop.f32.mrf.mxu2 }
 0x132   : > { %v641_v56 = vadd.f32 %v640_v55, %v1676_v49  ;;  %866 = vmatmul.bf16.vlgmr.msra.gmra.mxu3 %v710_v54 }
 0x133   : > { %v594_v57 = vpop.f32.mrf.mxu1 }
 0x134   : > { %v681_v59 = vmax.f32 %v641_v56, 0.0  ;;  %v595_v62 = vadd.f32 %v594_v57, %v1673_v45 }
 0x136   : > { %v711_v60 = vpack.c.bf16 %v681_v59, %v679_v58  ;;  %v682_v1 = vmax.f32 %v595_v62, 0.0 }
 0x138   : > { %915 = vmatmul.bf16.vlgmr.msrb.gmra.mxu0 %v711_v60 }
 0x139   : > { %v643_v61 = vpop.f32.mrf.mxu2 }
 0x13a   : > { %v644_v3 = vadd.f32 %v643_v61, %v1676_v49 }
 0x13b   : > { %v596_v63 = vpop.f32.mrf.mxu1 }
 0x13c   : > { %v597_v0 = vadd.f32 %v596_v63, %v1673_v45  ;;  %v683_v8 = vmax.f32 %v644_v3, 0.0 }
 0x13e   : > { %v684_v2 = vmax.f32 %v597_v0, 0.0 }
 0x140   : > { %v712_v4 = vpack.c.bf16 %v684_v2, %v682_v1 }
 0x141   : > { %v645_v5 = vpop.f32.mrf.mxu2 }
 0x142   : > { %v646_v6 = vadd.f32 %v645_v5, %v1676_v49  ;;  %871 = vmatmul.bf16.gmra.mxu3 %v712_v4 }
 0x143   : > { %v599_v7 = vpop.f32.mrf.mxu1 }
 0x144   : > { %v685_v9 = vmax.f32 %v646_v6, 0.0  ;;  %v600_v12 = vadd.f32 %v599_v7, %v1673_v45 }
 0x146   : > { %v713_v10 = vpack.c.bf16 %v685_v9, %v683_v8  ;;  %v686_v15 = vmax.f32 %v600_v12, 0.0 }
 0x148   : > { %920 = vmatmul.bf16.gmra.mxu0 %v713_v10 }
 0x149   : > { %v648_v11 = vpop.f32.mrf.mxu2 }
 0x14a   : > { %v649_v17 = vadd.f32 %v648_v11, %v1676_v49 }
 0x14b   : > { %v601_v13 = vpop.f32.mrf.mxu1 }
 0x14c   : > { %v602_v14 = vadd.f32 %v601_v13, %v1673_v45  ;;  %v687_v22 = vmax.f32 %v649_v17, 0.0 }
 0x14e   : > { %v688_v16 = vmax.f32 %v602_v14, 0.0 }
 0x150   : > { %v714_v18 = vpack.c.bf16 %v688_v16, %v686_v15 }
 0x151   : > { %v650_v19 = vpop.f32.mrf.mxu2 }
 0x152   : > { %v651_v20 = vadd.f32 %v650_v19, %v1676_v49  ;;  %876 = vmatmul.bf16.gmra.mxu3 %v714_v18 }
 0x153   : > { %v604_v21 = vpop.f32.mrf.mxu1 }
 0x154   : > { %v689_v23 = vmax.f32 %v651_v20, 0.0  ;;  %v605_v26 = vadd.f32 %v604_v21, %v1673_v45 }
 0x156   : > { %v715_v24 = vpack.c.bf16 %v689_v23, %v687_v22  ;;  %v690_v29 = vmax.f32 %v605_v26, 0.0 }
 0x158   : > { %925 = vmatmul.bf16.gmra.mxu0 %v715_v24 }
 0x159   : > { %v653_v25 = vpop.f32.mrf.mxu2 }
 0x15a   : > { %v654_v31 = vadd.f32 %v653_v25, %v1676_v49 }
 0x15b   : > { %v606_v27 = vpop.f32.mrf.mxu1 }
 0x15c   : > { %v607_v28 = vadd.f32 %v606_v27, %v1673_v45  ;;  %v691_v37 = vmax.f32 %v654_v31, 0.0 }
 0x15e   : > { %v692_v30 = vmax.f32 %v607_v28, 0.0 }
 0x160   : > { %v716_v32 = vpack.c.bf16 %v692_v30, %v690_v29 }
 0x161   : > { %v655_v33 = vpop.f32.mrf.mxu2 }
 0x162   : > { %v656_v34 = vadd.f32 %v655_v33, %v1676_v49  ;;  %881 = vmatmul.bf16.gmra.mxu3 %v716_v32  ;;  %v1712_v32 = vld [vmem:[%s1789_s6] ss:$0 sm:$0xff] }
 0x163   : > { %v609_v36 = vpop.f32.mrf.mxu1 }
 0x164   : > { %v693_v38 = vmax.f32 %v656_v34, 0.0  ;;  %v610_v41 = vadd.f32 %v609_v36, %v1673_v45 }
 0x166   : > { %v717_v39 = vpack.c.bf16 %v693_v38, %v691_v37  ;;  %v694_v44 = vmax.f32 %v610_v41, 0.0 }
 0x168   : > { %930 = vmatmul.bf16.gmra.mxu0 %v717_v39 }
 0x169   : > { %v658_v40 = vpop.f32.mrf.mxu2 }
 0x16a   : > { %v659_v46 = vadd.f32 %v658_v40, %v1676_v49 }
 0x16b   : > { %v611_v42 = vpop.f32.mrf.mxu1 }
 0x16c   : > { %v612_v43 = vadd.f32 %v611_v42, %v1673_v45  ;;  %v695_v52 = vmax.f32 %v659_v46, 0.0 }
 0x16e   : > { %v696_v35 = vmax.f32 %v612_v43, 0.0 }
 0x170   : > { %v718_v47 = vpack.c.bf16 %v696_v35, %v694_v44 }
 0x171   : > { %v660_v48 = vpop.f32.mrf.mxu2 }
 0x172   : > { %v661_v50 = vadd.f32 %v660_v48, %v1676_v49  ;;  %886 = vmatmul.bf16.gmra.mxu3 %v718_v47 }
 0x173   : > { %v614_v51 = vpop.f32.mrf.mxu1 }
 0x174   : > { %v697_v53 = vmax.f32 %v661_v50, 0.0  ;;  %v615_v56 = vadd.f32 %v614_v51, %v1673_v45 }
 0x176   : > { %v719_v54 = vpack.c.bf16 %v697_v53, %v695_v52  ;;  %v698_v59 = vmax.f32 %v615_v56, 0.0 }
 0x178   : > { %935 = vmatmul.bf16.vlgmr.msrb.gmra.mxu2 %v719_v54 }
 0x179   : > { %v663_v55 = vpop.f32.mrf.mxu2 }
 0x17a   : > { %v664_v61 = vadd.f32 %v663_v55, %v1676_v49 }
 0x17b   : > { %v616_v57 = vpop.f32.mrf.mxu1 }
 0x17c   : > { %v617_v58 = vadd.f32 %v616_v57, %v1673_v45  ;;  %v699_v2 = vmax.f32 %v664_v61, 0.0 }
 0x17e   : > { %v700_v60 = vmax.f32 %v617_v58, 0.0 }
 0x180   : > { %v720_v62 = vpack.c.bf16 %v700_v60, %v698_v59 }
 0x181   : > { %v665_v63 = vpop.f32.mrf.mxu2 }
 0x182   : > { %v666_v0 = vadd.f32 %v665_v63, %v1676_v49  ;;  %891 = vmatmul.bf16.gmra.mxu3 %v720_v62 }
 0x183   : > { %v619_v1 = vpop.f32.mrf.mxu1 }
 0x184   : > { %v701_v3 = vmax.f32 %v666_v0, 0.0  ;;  %v620_v6 = vadd.f32 %v619_v1, %v1673_v45 }
 0x186   : > { %v721_v4 = vpack.c.bf16 %v701_v3, %v699_v2  ;;  %v702_v9 = vmax.f32 %v620_v6, 0.0 }
 0x188   : > { %940 = vmatmul.bf16.gmra.mxu2 %v721_v4 }
 0x189   : > { %v668_v5 = vpop.f32.mrf.mxu2 }
 0x18a   : > { %v669_v11 = vadd.f32 %v668_v5, %v1676_v49 }
 0x18b   : > { %v621_v7 = vpop.f32.mrf.mxu1 }
 0x18c   : > { %v622_v8 = vadd.f32 %v621_v7, %v1673_v45  ;;  %v703_v16 = vmax.f32 %v669_v11, 0.0 }
 0x18e   : > { %v704_v10 = vmax.f32 %v622_v8, 0.0 }
 0x190   : > { %v722_v12 = vpack.c.bf16 %v704_v10, %v702_v9 }
 0x191   : > { %v670_v13 = vpop.f32.mrf.mxu2 }
 0x192   : > { %v671_v14 = vadd.f32 %v670_v13, %v1676_v49  ;;  %896 = vmatmul.bf16.gmra.mxu3 %v722_v12 }
 0x193   : > { %v624_v15 = vpop.f32.mrf.mxu1 }
 0x194   : > { %v705_v17 = vmax.f32 %v671_v14, 0.0  ;;  %v625_v20 = vadd.f32 %v624_v15, %v1673_v45 }
 0x196   : > { %v723_v18 = vpack.c.bf16 %v705_v17, %v703_v16  ;;  %v706_v23 = vmax.f32 %v625_v20, 0.0 }
 0x198   : > { %945 = vmatmul.bf16.gmra.mxu2 %v723_v18 }
 0x199   : > { %v673_v19 = vpop.f32.mrf.mxu2 }
 0x19a   : > { %v674_v25 = vadd.f32 %v673_v19, %v1676_v49 }
 0x19b   : > { %v626_v21 = vpop.f32.mrf.mxu1 }
 0x19c   : > { %v627_v22 = vadd.f32 %v626_v21, %v1673_v45  ;;  %v707_v29 = vmax.f32 %v674_v25, 0.0 }
 0x19e   : > { %v708_v24 = vmax.f32 %v627_v22, 0.0 }
 0x1a0   : > { %v724_v26 = vpack.c.bf16 %v708_v24, %v706_v23 }
 0x1a1   : > { %v675_v27 = vpop.f32.mrf.mxu2 }
 0x1a2   : > { %v676_v28 = vadd.f32 %v675_v27, %v1676_v49  ;;  %901 = vmatmul.bf16.gmra.mxu3 %v724_v26 }
 0x1a4   : > { %v709_v30 = vmax.f32 %v676_v28, 0.0 }
 0x1a6   : > { %v725_v31 = vpack.c.bf16 %v709_v30, %v707_v29 }
 0x1a8   : > { %950 = vmatmul.bf16.gmra.mxu2 %v725_v31 }
 0x1b5   : > { %v867_v33 = vpop.f32.mrf.mxu3  ;;  %v916_v45 = vpop.f32.mrf.mxu0 }
 0x1b6   : > { %v868_v34 = vadd.f32 %v1712_v32, %v867_v33 }
 0x1b8   : > { %v917_v36 = vadd.f32 %v916_v45, %v868_v34 }
 0x1ba   : > { %v956_v40 = vmax.f32 %v917_v36, 0.0 }
 0x1bd   : > { %v869_v37 = vpop.f32.mrf.mxu3  ;;  %v918_v38 = vpop.f32.mrf.mxu0 }
 0x1be   : > { %v870_v39 = vadd.f32 %v1712_v32, %v869_v37 }
 0x1c0   : > { %v919_v49 = vadd.f32 %v918_v38, %v870_v39 }
 0x1c2   : > { %v957_v41 = vmax.f32 %v919_v49, 0.0 }
 0x1c4   : > { %v1716_v42 = vpack.c.bf16 %v957_v41, %v956_v40 }
 0x1c5   : > { %v872_v43 = vpop.f32.mrf.mxu3  ;;  %v921_v44 = vpop.f32.mrf.mxu0 }
 0x1c6   : > { %v873_v35 = vadd.f32 %v1712_v32, %v872_v43 }
 0x1c8   : > { %v922_v48 = vadd.f32 %v921_v44, %v873_v35 }
 0x1ca   : > { %v958_v52 = vmax.f32 %v922_v48, 0.0 }
 0x1cd   : > { %v874_v46 = vpop.f32.mrf.mxu3  ;;  %v923_v47 = vpop.f32.mrf.mxu0 }
 0x1ce   : > { %v875_v50 = vadd.f32 %v1712_v32, %v874_v46 }
 0x1d0   : > { %v924_v51 = vadd.f32 %v923_v47, %v875_v50 }
 0x1d2   : > { %v959_v53 = vmax.f32 %v924_v51, 0.0 }
 0x1d4   : > { %v1720_v54 = vpack.c.bf16 %v959_v53, %v958_v52 }
 0x1d5   : > { %v877_v55 = vpop.f32.mrf.mxu3  ;;  %v926_v56 = vpop.f32.mrf.mxu0 }
 0x1d6   : > { %v878_v57 = vadd.f32 %v1712_v32, %v877_v55 }
 0x1d8   : > { %v927_v60 = vadd.f32 %v926_v56, %v878_v57 }
 0x1da   : > { %v960_v63 = vmax.f32 %v927_v60, 0.0 }
 0x1dd   : > { %v879_v58 = vpop.f32.mrf.mxu3  ;;  %v928_v59 = vpop.f32.mrf.mxu0 }
 0x1de   : > { %v880_v61 = vadd.f32 %v1712_v32, %v879_v58 }
 0x1e0   : > { %v929_v62 = vadd.f32 %v928_v59, %v880_v61 }
 0x1e2   : > { %v961_v0 = vmax.f32 %v929_v62, 0.0 }
 0x1e4   : > { %v1724_v1 = vpack.c.bf16 %v961_v0, %v960_v63 }
 0x1e5   : > { %v882_v2 = vpop.f32.mrf.mxu3  ;;  %v931_v3 = vpop.f32.mrf.mxu0 }
 0x1e6   : > { %v883_v4 = vadd.f32 %v1712_v32, %v882_v2  ;;  %v1410_v2 = vmov 0  }
 0x1e7   : > { %1343 = vset.pattern.permute.xlu0 %v1410_v2 }
 0x1e8   : > { %v932_v6 = vadd.f32 %v931_v3, %v883_v4  ;;  %v998_v3 = vsel %vm555_vm1, %v1724_v1, 0  ;;  %v995_v4 = vsel %vm555_vm1, %v1720_v54, 0 }
 0x1ea   : > { %v962_v10 = vmax.f32 %v932_v6, 0.0  ;;  %v980_v6 = vld [vmem:[%s1790_s7] sm:$0x1] }
 0x1ed   : > { %v884_v5 = vpop.f32.mrf.mxu3  ;;  %v933_v8 = vpop.f32.mrf.mxu0 }
 0x1ee   : > { %v885_v7 = vadd.f32 %v1712_v32, %v884_v5  ;;  %v992_v5 = vsel %vm555_vm1, %v1716_v42, 0 }
 0x1f0   : > { %v934_v9 = vadd.f32 %v933_v8, %v885_v7 }
 0x1f2   : > { %v963_v11 = vmax.f32 %v934_v9, 0.0 }
 0x1f4   : > { %v975_v12 = vpack.c.bf16 %v963_v11, %v962_v10 }
 0x1f5   : > { %v887_v13 = vpop.f32.mrf.mxu3 }
 0x1f6   : > { %v888_v14 = vadd.f32 %v1712_v32, %v887_v13  ;;  %v1001_v0 = vsel %vm555_vm1, %v975_v12, 0 }
 0x1fb   : > { %v936_v15 = vpop.f32.mrf.mxu2 }
 0x1fc   : > { %v937_v16 = vadd.f32 %v936_v15, %v888_v14 }
 0x1fd   : > { %v889_v17 = vpop.f32.mrf.mxu3 }
 0x1fe   : > { %v890_v18 = vadd.f32 %v1712_v32, %v889_v17  ;;  %v964_v22 = vmax.f32 %v937_v16, 0.0 }
 0x203   : > { %v938_v19 = vpop.f32.mrf.mxu2 }
 0x204   : > { %v939_v20 = vadd.f32 %v938_v19, %v890_v18 }
 0x205   : > { %v892_v21 = vpop.f32.mrf.mxu3 }
 0x206   : > { %v965_v23 = vmax.f32 %v939_v20, 0.0  ;;  %v893_v53 = vadd.f32 %v1712_v32, %v892_v21 }
 0x208   : > { %v976_v24 = vpack.c.bf16 %v965_v23, %v964_v22 }
 0x20a   : > { %v1004_v63 = vsel %vm555_vm1, %v976_v24, 0 }
 0x20b   : > { %v941_v25 = vpop.f32.mrf.mxu2 }
 0x20c   : > { %v942_v57 = vadd.f32 %v941_v25, %v893_v53 }
 0x20d   : > { %v894_v26 = vpop.f32.mrf.mxu3 }
 0x20e   : > { %v895_v51 = vadd.f32 %v1712_v32, %v894_v26  ;;  %v966_v60 = vmax.f32 %v942_v57, 0.0 }
 0x213   : > { %v943_v27 = vpop.f32.mrf.mxu2 }
 0x214   : > { %v944_v55 = vadd.f32 %v943_v27, %v895_v51 }
 0x215   : > { %v897_v28 = vpop.f32.mrf.mxu3 }
 0x216   : > { %v898_v41 = vadd.f32 %v1712_v32, %v897_v28  ;;  %v967_v58 = vmax.f32 %v944_v55, 0.0 }
 0x218   : > { %v977_v61 = vpack.c.bf16 %v967_v58, %v966_v60 }
 0x21a   : > { %v1007_v62 = vsel %vm555_vm1, %v977_v61, 0 }
 0x21b   : > { %v946_v29 = vpop.f32.mrf.mxu2 }
 0x21c   : > { %v947_v46 = vadd.f32 %v946_v29, %v898_v41 }
 0x21d   : > { %v899_v30 = vpop.f32.mrf.mxu3 }
 0x21e   : > { %v900_v49 = vadd.f32 %v1712_v32, %v899_v30  ;;  %v968_v52 = vmax.f32 %v947_v46, 0.0 }
 0x223   : > { %v948_v31 = vpop.f32.mrf.mxu2 }
 0x224   : > { %v949_v43 = vadd.f32 %v948_v31, %v900_v49 }
 0x225   : > { %v902_v33 = vpop.f32.mrf.mxu3 }
 0x226   : > { %v903_v36 = vadd.f32 %v1712_v32, %v902_v33  ;;  %v969_v48 = vmax.f32 %v949_v43, 0.0 }
 0x228   : > { %v978_v56 = vpack.c.bf16 %v969_v48, %v968_v52 }
 0x22a   : > { %v1010_v59 = vsel %vm555_vm1, %v978_v56, 0 }
 0x22b   : > { %v951_v45 = vpop.f32.mrf.mxu2 }
 0x22c   : > { %v952_v37 = vadd.f32 %v951_v45, %v903_v36 }
 0x22d   : > { %v904_v34 = vpop.f32.mrf.mxu3 }
 0x22e   : > { %v905_v38 = vadd.f32 %v1712_v32, %v904_v34  ;;  %v970_v44 = vmax.f32 %v952_v37, 0.0  ;;  %v981_v32 = vld [vmem:[#allocation2] sm:$0x1] }
 0x22f   : > { %984 = vperm.xlu0 %1343, %v981_v32  }
 0x233   : > { %v953_v39 = vpop.f32.mrf.mxu2 }
 0x234   : > { %v954_v40 = vadd.f32 %v953_v39, %v905_v38 }
 0x236   : > { %v971_v35 = vmax.f32 %v954_v40, 0.0 }
 0x238   : > { %v979_v47 = vpack.c.bf16 %v971_v35, %v970_v44 }
 0x23a   : > { %v1013_v50 = vsel %vm555_vm1, %v979_v47, 0 }
 0x23b   : > { %1015 = vmatpush.bf16.xpose.msrb.mxu1 %v1013_v50 }
 0x243   : > { %1016 = vmatpush.bf16.xpose.msrb.mxu1 %v1010_v59 }
 0x24b   : > { %1017 = vmatpush.bf16.xpose.msrb.mxu1 %v1007_v62 }
 0x253   : > { %1018 = vmatpush.bf16.xpose.msrb.mxu1 %v1004_v63 }
 0x25b   : > { %1019 = vmatpush.bf16.xpose.msrb.mxu1 %v1001_v0 }
 0x263   : > { %1020 = vmatpush.bf16.xpose.msrb.mxu1 %v998_v3 }
 0x26b   : > { %1021 = vmatpush.bf16.xpose.msrb.mxu1 %v995_v4 }
 0x273   : > { %1022 = vmatpush.bf16.xpose.msrb.mxu1 %v992_v5 }
 0x27a   : > { %1259 = vmatmul.msk.bf16.vlgmr.msrb.gmra.mxu1 %vm555_vm1, %v980_v6 }
 0x2a1   : > { %v985_v7 = vpop.permute.xlu0 %984 }
 0x2a2   : > { %v987_v1 = vperm.slane %v985_v7, 0 }
 0x2f7   : > { %v1024_v54 = vpop.f32.mrf.mxu1 }
 0x2f8   : > { %v1025_v42 = vadd.f32 %v1024_v54, %v987_v1 }
 0x2fa   : > { %1028 = vst [vmem:[%s327_s29] sm:$0x1] %v1025_v42 }
 0x2fb   : > { %1373 = shalt.err (!%p1370_p3)
}
 0x2fc   : > { %1303 = dma.vmem_to_hbm [thread:$0]  (%p1502_p5), %s1041_s30, 16, %s1043_s10, %s1030_s15  }
 0x2ff   : > { %v1026_v8 = vpop.f32.mrf.mxu1 }
 0x300 PF: > { %p1309_p4 = scmp.ge.s32.totalorder %s1408_s14, 2  ;;  %s1054_s25 = sand.u32 1, %s1396_s11  }
 0x301   : > { %s1055_s26 = scalar_lea.sflag [#allocation4], %s1054_s25 }
 0x302   : > { %p1306_p7 = pnand %p1309_p4, %p1506_p6 }
 0x304   : > { %p1307_p8 = pneg %p1306_p7 }
 0x306   : > { %1391 = dma.done.wait (%p1307_p8), %s1055_s26, 16  }
 0x307   : > { %1393 = vsyncadd (%p1307_p8), %s1055_s26, 4294967280  ;;  %p21_p9 = scmp.ge.s32.totalorder %s1489_s16, 5   ;;  %s1795_s11 = smov %s1400_s12 }
 0x308   : > { %s1796_s12 = smov %s1404_s13  ;;  %s1797_s13 = smov %s1500_s19 }
 0x309   : > { %s1798_s14 = smov %s1489_s16  ;;  %23 = sbr.rel (!%p21_p9) target bundleno = 6 (0x6), region = 91 }
 0x30e   :  { %1060 = vsyncpa [#allocation4], 1 }
 0x30f   :  { %1062 = vsyncpa [#allocation4 + $0x1], 1 }

</bundles_post_ra>
